<compile_context>
chip_gen: v6e
topology: v6e:2x2x1
jax: 0.10.0
libtpu: 0.0.40
codegen_flags: <defaults>
</compile_context>

<pallas_src>
import math
from typing import NamedTuple

import jax
import jax.numpy as jnp
from jax.experimental import pallas as pl
from jax.experimental.pallas import tpu as pltpu


def _round_up(v, m):
    return ((v + m - 1) // m) * m


def _largest_aligned_divisor(total, target, align=128):
    """Largest multiple of `align` that divides `total` and is <= target.

    `total` must itself be a positive multiple of `align` (so `align` always
    divides and the loop terminates).
    """
    target = max(align, min(total, target))
    t = (target // align) * align
    while t > align and total % t:
        t -= align
    return t


def _shrink_divisor(cur, total, align=128):
    """Next smaller aligned divisor of `total` below `cur` (roughly halved)."""
    if cur <= align:
        return cur
    return _largest_aligned_divisor(total, max(align, cur // 2), align)


def _tpu_generation_info():
    """Generation-aware knobs (v5e/v6e: 128 MiB VMEM, 1 TC; v7x: 64 MiB, 2 TC)."""
    kind = ""
    try:
        kind = jax.devices()[0].device_kind.lower()
    except Exception:
        pass
    vmem = None
    try:
        vmem = int(pltpu.get_tpu_info().vmem_capacity_bytes)
    except Exception:
        vmem = None
    is_v7 = ("v7" in kind) or ("7x" in kind)
    if vmem is None:
        vmem = 64 * 2**20 if is_v7 else 128 * 2**20
    num_tensorcores = 2 if is_v7 else 1
    if vmem >= 120 * 2**20:            # 128-MiB parts (v5e / v6e)
        budget = 96 * 2**20
        cap = 100 * 2**20
    else:                              # 64-MiB parts (v7x) or unknown/small
        budget = min(48 * 2**20, max(24 * 2**20, vmem - 16 * 2**20))
        cap = min(56 * 2**20, max(budget, vmem - 8 * 2**20))
    return dict(device_kind=kind, num_tensorcores=num_tensorcores,
                vmem_bytes=vmem, vmem_budget=budget, vmem_limit_cap=cap,
                default_block_rows=512)


class MlpParams(NamedTuple):
    w1: jax.Array    # (Din_p, Dh_p)  compute dtype
    b1: jax.Array    # (1, Dh_p)      f32
    w2: jax.Array    # (Dh_p, Dout_p) compute dtype
    b2: jax.Array    # (1, Dout_p)    f32
    din: int
    dh: int
    dout: int


def _pad_cast_2d(a, rows_p, cols_p, dtype):
    a = a.astype(dtype)                     # no-op if already the right dtype
    r, c = a.shape
    if r != rows_p or c != cols_p:          # skip the copy if already aligned
        a = jnp.pad(a, ((0, rows_p - r), (0, cols_p - c)))
    return a


def _pad_cast_bias(b, cols_p):
    b = b.astype(jnp.float32)
    c = b.shape[0]
    if c != cols_p:
        b = jnp.pad(b, (0, cols_p - c))
    return b.reshape(1, cols_p)


def prepare_mlp_params(w1, b1, w2, b2, compute_dtype=jnp.bfloat16):
    """Pad feature dims to multiples of 128 and cast weights ONCE.

    Hoisted out of the per-call path: call at init and reuse the result across
    steps.  Zero padding keeps results exact (pad cols of W1/b1 give h=0, and
    pad rows of W2 contribute 0).
    """
    Din, Dh = w1.shape
    Dh2, Dout = w2.shape
    assert Dh2 == Dh and b1.shape == (Dh,) and b2.shape == (Dout,)
    Din_p = _round_up(Din, 128)
    Dh_p = _round_up(Dh, 128)
    Dout_p = _round_up(Dout, 128)
    return MlpParams(
        w1=_pad_cast_2d(w1, Din_p, Dh_p, compute_dtype),
        b1=_pad_cast_bias(b1, Dh_p),
        w2=_pad_cast_2d(w2, Dh_p, Dout_p, compute_dtype),
        b2=_pad_cast_bias(b2, Dout_p),
        din=Din, dh=Dh, dout=Dout)


def _make_mlp_kernel(n_sub, tk_sub, din_tiled):
    """y = relu(x @ W1 + b1) @ W2 + b2 over a (rows, hidden, Din) grid.

    NOTE: o_ref is written exactly once, at the last (hidden, Din) reduction
    step.  This relies on the hidden (axis 1) and Din (axis 2) grid axes being
    the trailing "arbitrary" axes and on out_specs' index_map depending only on
    the row index.  Keep these in sync if the grid is ever reordered.
    """

    def kernel(x_ref, w1_ref, b1_ref, w2_ref, b2_ref, o_ref, acc_ref,
               *h_scratch):
        k = pl.program_id(1)                       # hidden slab index
        j = pl.program_id(2)                       # Din slab index (innermost)
        last_k = k == pl.num_programs(1) - 1
        last_j = j == pl.num_programs(2) - 1

        @pl.when((k == 0) & (j == 0))
        def _init_acc():
            # Seed the f32 output accumulator with the fc2 bias.
            acc_ref[...] = jnp.broadcast_to(b2_ref[...], acc_ref.shape)

        x = x_ref[...]

        if din_tiled:
            h_ref = h_scratch[0]

            @pl.when(j == 0)
            def _zero_h():
                h_ref[...] = jnp.zeros_like(h_ref)

            # fc1 partial: accumulate this Din slab into the f32 h scratch.
            for s in range(n_sub):
                sl = slice(s * tk_sub, (s + 1) * tk_sub)
                h_ref[:, sl] += jnp.dot(x, w1_ref[:, sl],
                                        preferred_element_type=jnp.float32)

            @pl.when(last_j)
            def _fc2():
                for s in range(n_sub):
                    sl = slice(s * tk_sub, (s + 1) * tk_sub)
                    h = jnp.maximum(h_ref[:, sl] + b1_ref[:, sl], 0.0)
                    # dropout(p=0.0) -> identity.
                    acc_ref[...] += jnp.dot(h.astype(w2_ref.dtype),
                                            w2_ref[sl, :],
                                            preferred_element_type=jnp.float32)
        else:
            # Single Din slab: fuse fc1 -> bias/ReLU -> fc2 per hidden sub-slab
            # so the fc1 matmul of sub-slab s+1 overlaps the VPU work of s.
            for s in range(n_sub):
                sl = slice(s * tk_sub, (s + 1) * tk_sub)
                h = jnp.dot(x, w1_ref[:, sl],
                            preferred_element_type=jnp.float32)
                h = jnp.maximum(h + b1_ref[:, sl], 0.0)
                # dropout(p=0.0) -> identity.
                acc_ref[...] += jnp.dot(h.astype(w2_ref.dtype), w2_ref[sl, :],
                                        preferred_element_type=jnp.float32)

        @pl.when(last_k & last_j)
        def _store():
            # dropout(p=0.0) -> identity.
            o_ref[...] = acc_ref[...].astype(o_ref.dtype)

    return kernel


def mlp_pallas_prepared(x, params, *, block_rows=None, block_hidden=512,
                        block_din=None, out_dtype=None,
                        vmem_budget_bytes=None):
    """Apply the MLP using pre-padded/cast params from prepare_mlp_params()."""
    Din, Dh, Dout = params.din, params.dh, params.dout
    w1p, b1p, w2p, b2p = params.w1, params.b1, params.w2, params.b2
    Din_p, Dh_p = w1p.shape
    Dout_p = w2p.shape[1]
    compute_dtype = w1p.dtype
    out_dtype = out_dtype or x.dtype

    orig_shape = x.shape
    assert orig_shape[-1] == Din, (orig_shape, Din)
    x2d = x.reshape(-1, Din)
    N = x2d.shape[0]

    info = _tpu_generation_info()
    if block_rows is None:
        block_rows = info["default_block_rows"]
    if vmem_budget_bytes is None:
        vmem_budget_bytes = info["vmem_budget"]
    limit_cap = info["vmem_limit_cap"]

    # Row tile (parallel axis).  Large tm => more weight reuse per HBM pass.
    tm = min(block_rows, _round_up(N, 8))
    if info["num_tensorcores"] >= 2 and N > 8 and _round_up(N, tm) // tm < 2:
        # Only on 2-TensorCore parts (v7x): keep >=2 programs on the parallel
        # axis so both cores get work.  On 1-TC parts this would just double
        # weight re-streaming for zero parallelism gain.
        tm = _round_up((N + 1) // 2, 8)

    # Hidden slab and Din slab sizes: 128-aligned divisors of the padded dims.
    tk = _largest_aligned_divisor(Dh_p, block_hidden)
    td = Din_p if block_din is None else _largest_aligned_divisor(Din_p, block_din)

    itm_c = jnp.dtype(compute_dtype).itemsize
    itm_o = jnp.dtype(out_dtype).itemsize

    def footprint(tm_, tk_, td_):
        fp = (2 * tm_ * td_ * itm_c            # x tile (double-buffered)
              + 2 * td_ * tk_ * itm_c          # W1 slab (double-buffered)
              + 2 * tk_ * Dout_p * itm_c       # W2 slab (double-buffered)
              + 2 * tk_ * 4 + 2 * Dout_p * 4   # biases (f32, double-buffered)
              + 2 * tm_ * Dout_p * itm_o       # output tile
              + tm_ * Dout_p * 4               # f32 accumulator scratch
              + 6 * tm_ * tk_)                 # in-body f32 h + bf16 cast temps
        if td_ < Din_p:
            fp += tm_ * tk_ * 4                # f32 h-accumulator scratch
        return fp

    # Shrink order: Din slab first (preserves MXU tile shapes and weight
    # reuse), then hidden slab, then rows, then Din slab down to its floor.
    while footprint(tm, tk, td) > vmem_budget_bytes and td > 512:
        new = _shrink_divisor(td, Din_p)
        if new == td:
            break
        td = new
    while footprint(tm, tk, td) > vmem_budget_bytes and tk > 128:
        new = _shrink_divisor(tk, Dh_p)
        if new == tk:
            break
        tk = new
    while footprint(tm, tk, td) > vmem_budget_bytes and tm > 8:
        tm = max(8, _round_up(tm // 2, 8))
    while footprint(tm, tk, td) > vmem_budget_bytes and td > 128:
        new = _shrink_divisor(td, Din_p)
        if new == td:
            break
        td = new

    din_tiled = td < Din_p
    n_sub = 2 if tk % 256 == 0 else 1
    tk_sub = tk // n_sub

    N_p = _round_up(N, tm)

    # Only x needs per-call prep: cast to the compute dtype, pad rows/features
    # only when required (weights were padded/cast once at prepare time).
    xp = x2d.astype(compute_dtype)
    if N_p != N or Din_p != Din:
        xp = jnp.pad(xp, ((0, N_p - N), (0, Din_p - Din)))

    grid = (N_p // tm, Dh_p // tk, Din_p // td)

    scratch = [pltpu.VMEM((tm, Dout_p), jnp.float32)]
    if din_tiled:
        scratch.append(pltpu.VMEM((tm, tk), jnp.float32))

    fp = footprint(tm, tk, td)
    vmem_limit = int(max(min(limit_cap, max(32 * 2**20, fp + 8 * 2**20)),
                         fp + 2 * 2**20))

    out = pl.pallas_call(
        _make_mlp_kernel(n_sub, tk_sub, din_tiled),
        out_shape=jax.ShapeDtypeStruct((N_p, Dout_p), out_dtype),
        grid=grid,
        in_specs=[
            pl.BlockSpec((tm, td),     lambda i, k, j: (i, j)),  # x tile
            pl.BlockSpec((td, tk),     lambda i, k, j: (j, k)),  # W1 slab
            pl.BlockSpec((1, tk),      lambda i, k, j: (0, k)),  # b1 slab
            pl.BlockSpec((tk, Dout_p), lambda i, k, j: (k, 0)),  # W2 slab
            pl.BlockSpec((1, Dout_p),  lambda i, k, j: (0, 0)),  # b2 (resident)
        ],
        out_specs=pl.BlockSpec((tm, Dout_p), lambda i, k, j: (i, 0)),
        scratch_shapes=scratch,
        compiler_params=pltpu.CompilerParams(
            dimension_semantics=("parallel", "arbitrary", "arbitrary"),
            vmem_limit_bytes=vmem_limit),
    )(xp, w1p, b1p, w2p, b2p)

    return out[:N, :Dout].reshape(*orig_shape[:-1], Dout)


def mlp_pallas(x, w1, b1, w2, b2, *, compute_dtype=jnp.bfloat16, **kwargs):
    """Convenience wrapper that pads/casts weights per call.

    For steady-state use, call prepare_mlp_params() once and
    mlp_pallas_prepared() per step to avoid the per-call weight pad/cast pass.
    """
    params = prepare_mlp_params(w1, b1, w2, b2, compute_dtype=compute_dtype)
    return mlp_pallas_prepared(x, params, **kwargs)


def init_mlp_params(key, in_features, hidden_features=None, out_features=None,
                    dtype=jnp.float32):
    """Mimics nn.Linear default init (uniform +-1/sqrt(fan_in)).

    Weights are returned already transposed to (in, out) layout for the kernel.
    """
    out_features = out_features or in_features
    hidden_features = hidden_features or in_features // 4
    k1, k2, k3, k4 = jax.random.split(key, 4)

    bound1 = 1.0 / math.sqrt(in_features)
    w1 = jax.random.uniform(k1, (in_features, hidden_features),
                            minval=-bound1, maxval=bound1, dtype=dtype)
    b1 = jax.random.uniform(k2, (hidden_features,),
                            minval=-bound1, maxval=bound1, dtype=dtype)

    bound2 = 1.0 / math.sqrt(hidden_features)
    w2 = jax.random.uniform(k3, (hidden_features, out_features),
                            minval=-bound2, maxval=bound2, dtype=dtype)
    b2 = jax.random.uniform(k4, (out_features,),
                            minval=-bound2, maxval=bound2, dtype=dtype)
    return w1, b1, w2, b2


def mlp_reference(x, w1, b1, w2, b2):
    h = jnp.maximum(x @ w1 + b1, 0.0)
    return h @ w2 + b2


if __name__ == "__main__":
    key = jax.random.PRNGKey(0)
    kx, kp, kx2, kp2 = jax.random.split(key, 4)

    # Shapes consistent with the module defaults: hidden = in_features // 4.
    batch, seq, in_features = 2, 8, 32
    x = jax.random.normal(kx, (batch, seq, in_features), dtype=jnp.float32)
    w1, b1, w2, b2 = init_mlp_params(kp, in_features)

    # Steady-state path: pad/cast the weights once, reuse across calls.
    params = prepare_mlp_params(w1, b1, w2, b2)
    out = jax.block_until_ready(mlp_pallas_prepared(x, params))
    ref = mlp_reference(x, w1, b1, w2, b2)
    assert out.shape == (batch, seq, in_features), out.shape
    # bf16 matmul inputs with f32 accumulation -> loose-ish tolerance.
    assert jnp.allclose(out, ref, atol=2e-2, rtol=2e-2), "mismatch (prepared)"

    # Convenience (per-call prepare) path must agree.
    out_conv = jax.block_until_ready(mlp_pallas(x, w1, b1, w2, b2))
    assert jnp.allclose(out_conv, ref, atol=2e-2, rtol=2e-2), "mismatch (conv)"

    # Exercise the 2-sub-slab and Din-tiled reduction paths on a slightly
    # larger (still tiny) shape with explicit hidden/out features.
    in2, hid2, outf2 = 256, 512, 320
    x2 = jax.random.normal(kx2, (batch, seq, in2), dtype=jnp.float32)
    w1b, b1b, w2b, b2b = init_mlp_params(kp2, in2, hidden_features=hid2,
                                         out_features=outf2)
    params2 = prepare_mlp_params(w1b, b1b, w2b, b2b)
    ref2 = mlp_reference(x2, w1b, b1b, w2b, b2b)

    got2 = jax.block_until_ready(mlp_pallas_prepared(x2, params2))
    assert got2.shape == (batch, seq, outf2), got2.shape
    assert jnp.allclose(got2, ref2, atol=5e-2, rtol=5e-2), "mismatch (sub-slab)"

    got3 = jax.block_until_ready(
        mlp_pallas_prepared(x2, params2, block_din=128))  # force Din tiling
    assert jnp.allclose(got3, ref2, atol=5e-2, rtol=5e-2), "mismatch (Din-tiled)"

    print("KERNEL_OK")
</pallas_src>

<mosaic_0001>
module attributes {stable_mosaic.version = 11 : i64} {
  func.func @kernel(%arg0: i32, %arg1: i32, %arg2: i32, %arg3: memref<16x128xbf16, #tpu.memory_space<vmem>>, %arg4: memref<128x128xbf16, #tpu.memory_space<vmem>>, %arg5: memref<1x128xf32, #tpu.memory_space<vmem>>, %arg6: memref<128x128xbf16, #tpu.memory_space<vmem>>, %arg7: memref<1x128xf32, #tpu.memory_space<vmem>>, %arg8: memref<16x128xf32, #tpu.memory_space<vmem>>, %arg9: memref<16x128xf32, #tpu.memory_space<vmem>>) attributes {dimension_semantics = [#tpu.dimension_semantics<parallel>, #tpu.dimension_semantics<arbitrary>, #tpu.dimension_semantics<arbitrary>], iteration_bounds = array<i64: 1, 1, 1>, scalar_prefetch = 0 : i64, scratch_operands = 1 : i64, tpu.core_type = #tpu.core_type<tc>, window_params = [{transform_indices = @transform_0, window_bounds = array<i64: 16, 128>}, {transform_indices = @transform_1, window_bounds = array<i64: 128, 128>}, {transform_indices = @transform_2, window_bounds = array<i64: 1, 128>}, {transform_indices = @transform_3, window_bounds = array<i64: 128, 128>}, {pipeline_mode = #tpu.pipeline_mode<synchronous>, transform_indices = @transform_4, window_bounds = array<i64: 1, 128>}, {transform_indices = @transform_5, window_bounds = array<i64: 16, 128>}]} {
    %c0_i32 = arith.constant 0 : i32
    %0 = arith.cmpi eq, %arg1, %c0_i32 : i32
    %c0_i32_0 = arith.constant 0 : i32
    %1 = arith.cmpi eq, %arg2, %c0_i32_0 : i32
    %c0_i32_1 = arith.constant 0 : i32
    %2 = arith.cmpi eq, %arg1, %c0_i32_1 : i32
    %c0_i32_2 = arith.constant 0 : i32
    %3 = arith.cmpi eq, %arg2, %c0_i32_2 : i32
    %4 = arith.andi %2, %3 : i1
    %5 = arith.extui %4 : i1 to i32
    %c0_i32_3 = arith.constant 0 : i32
    %6 = arith.cmpi ne, %5, %c0_i32_3 : i32
    scf.if %6 {
      %c0_18 = arith.constant 0 : index
      %c0_19 = arith.constant 0 : index
      %24 = vector.load %arg7[%c0_18, %c0_19] : memref<1x128xf32, #tpu.memory_space<vmem>>, vector<1x128xf32>
      %25 = vector.shape_cast %24 : vector<1x128xf32> to vector<1x128xf32>
      %26 = vector.broadcast %25 : vector<1x128xf32> to vector<16x128xf32>
      %c0_20 = arith.constant 0 : index
      %c0_21 = arith.constant 0 : index
      %27 = vector.load %arg9[%c0_20, %c0_21] : memref<16x128xf32, #tpu.memory_space<vmem>>, vector<16x128xf32>
      tpu.vector_store %arg9[%c0_20, %c0_21], %26 {strides = array<i32>} : memref<16x128xf32, #tpu.memory_space<vmem>>, vector<16x128xf32>,
    } else {
    }
    %c0 = arith.constant 0 : index
    %c0_4 = arith.constant 0 : index
    %7 = vector.load %arg3[%c0, %c0_4] : memref<16x128xbf16, #tpu.memory_space<vmem>>, vector<16x128xbf16>
    %c0_5 = arith.constant 0 : index
    %c0_6 = arith.constant 0 : index
    %8 = vector.load %arg4[%c0_5, %c0_6] : memref<128x128xbf16, #tpu.memory_space<vmem>>, vector<128x128xbf16>
    %cst = arith.constant dense<0.000000e+00> : vector<16x128xf32>
    %9 = tpu.matmul %7, %8, %cst {dimension_numbers = #tpu.dot_dimension_numbers<[1], [0], [0], [1], [0, 0, 1, 1], [], []>} : vector<16x128xbf16>, vector<128x128xbf16>, vector<16x128xf32> -> vector<16x128xf32>
    %c0_7 = arith.constant 0 : index
    %c0_8 = arith.constant 0 : index
    %10 = vector.load %arg5[%c0_7, %c0_8] : memref<1x128xf32, #tpu.memory_space<vmem>>, vector<1x128xf32>
    %11 = vector.broadcast %10 : vector<1x128xf32> to vector<16x128xf32>
    %12 = arith.addf %9, %11 : vector<16x128xf32>
    %cst_9 = arith.constant 0.000000e+00 : f32
    %13 = vector.broadcast %cst_9 : f32 to vector<16x128xf32>
    %14 = arith.maximumf %12, %13 : vector<16x128xf32>
    %c0_10 = arith.constant 0 : index
    %c0_11 = arith.constant 0 : index
    %15 = vector.load %arg9[%c0_10, %c0_11] : memref<16x128xf32, #tpu.memory_space<vmem>>, vector<16x128xf32>
    %16 = arith.truncf %14 : vector<16x128xf32> to vector<16x128xbf16>
    %c0_12 = arith.constant 0 : index
    %c0_13 = arith.constant 0 : index
    %17 = vector.load %arg6[%c0_12, %c0_13] : memref<128x128xbf16, #tpu.memory_space<vmem>>, vector<128x128xbf16>
    %cst_14 = arith.constant dense<0.000000e+00> : vector<16x128xf32>
    %18 = tpu.matmul %16, %17, %cst_14 {dimension_numbers = #tpu.dot_dimension_numbers<[1], [0], [0], [1], [0, 0, 1, 1], [], []>} : vector<16x128xbf16>, vector<128x128xbf16>, vector<16x128xf32> -> vector<16x128xf32>
    %19 = arith.addf %15, %18 : vector<16x128xf32>
    %c0_15 = arith.constant 0 : index
    %c0_16 = arith.constant 0 : index
    %20 = vector.load %arg9[%c0_15, %c0_16] : memref<16x128xf32, #tpu.memory_space<vmem>>, vector<16x128xf32>
    tpu.vector_store %arg9[%c0_15, %c0_16], %19 {strides = array<i32>} : memref<16x128xf32, #tpu.memory_space<vmem>>, vector<16x128xf32>,
    %21 = arith.andi %0, %1 : i1
    %22 = arith.extui %21 : i1 to i32
    %c0_i32_17 = arith.constant 0 : i32
    %23 = arith.cmpi ne, %22, %c0_i32_17 : i32
    scf.if %23 {
      %c0_18 = arith.constant 0 : index
      %c0_19 = arith.constant 0 : index
      %24 = vector.load %arg9[%c0_18, %c0_19] : memref<16x128xf32, #tpu.memory_space<vmem>>, vector<16x128xf32>
      %c0_20 = arith.constant 0 : index
      %c0_21 = arith.constant 0 : index
      %25 = vector.load %arg8[%c0_20, %c0_21] : memref<16x128xf32, #tpu.memory_space<vmem>>, vector<16x128xf32>
      tpu.vector_store %arg8[%c0_20, %c0_21], %24 {strides = array<i32>} : memref<16x128xf32, #tpu.memory_space<vmem>>, vector<16x128xf32>,
    } else {
    }
    return
  }
  func.func @transform_0(%arg0: i32, %arg1: i32, %arg2: i32) -> (i32, i32) {
    %c0_i32 = arith.constant 0 : i32
    return %arg0, %arg2 : i32, i32
  }
  func.func @transform_1(%arg0: i32, %arg1: i32, %arg2: i32) -> (i32, i32) {
    %c0_i32 = arith.constant 0 : i32
    return %arg2, %arg1 : i32, i32
  }
  func.func @transform_2(%arg0: i32, %arg1: i32, %arg2: i32) -> (i32, i32) {
    %c0_i32 = arith.constant 0 : i32
    %c0_i32_0 = arith.constant 0 : i32
    return %c0_i32, %arg1 : i32, i32
  }
  func.func @transform_3(%arg0: i32, %arg1: i32, %arg2: i32) -> (i32, i32) {
    %c0_i32 = arith.constant 0 : i32
    %c0_i32_0 = arith.constant 0 : i32
    return %arg1, %c0_i32 : i32, i32
  }
  func.func @transform_4(%arg0: i32, %arg1: i32, %arg2: i32) -> (i32, i32) {
    %c0_i32 = arith.constant 0 : i32
    %c0_i32_0 = arith.constant 0 : i32
    %c0_i32_1 = arith.constant 0 : i32
    return %c0_i32, %c0_i32_0 : i32, i32
  }
  func.func @transform_5(%arg0: i32, %arg1: i32, %arg2: i32) -> (i32, i32) {
    %c0_i32 = arith.constant 0 : i32
    %c0_i32_0 = arith.constant 0 : i32
    return %arg0, %c0_i32 : i32, i32
  }
}

</mosaic_0001>

<bundles_post_ra>
// kernel: tpu_custom_call.1
= control target key start
LH: loop header
LB: loop body
LE: loop exit
PB: predicated region body
PF: predicated region fallthrough
CT: control target
= control target key end

     0   :  { %10 = vsyncpa [#allocation4], 0  ;;  %s584_s0 = inlined_call_operand.hbm [shape: bf16[16,128], index: 0, kind: input, shape index: {}]   ;;  %s585_s1 = inlined_call_operand.hbm [shape: bf16[128,128], index: 1, kind: input, shape index: {}]   ;;  %s586_s2 = inlined_call_operand.vmem [shape: f32[1,128], index: 2, kind: input, shape index: {}]   ;;  %s587_s3 = inlined_call_operand.hbm [shape: bf16[128,128], index: 3, kind: input, shape index: {}]   ;;  %s588_s4 = inlined_call_operand.vmem [shape: f32[1,128], index: 4, kind: input, shape index: {}]   ;;  %s589_s5 = inlined_call_operand.hbm [shape: f32[16,128], index: 5, kind: output, shape index: {}]  }
   0x1   :  { %11 = vsyncpa [#allocation7], 0 }
   0x2   :  { %12 = vsyncpa [#allocation5], 0  ;;  %s526_s18 = smov [#allocation6]   ;;  %s527_s20 = smov [#allocation3]  }
   0x3   :  { %s30_s19 = sshll.u32 %s526_s18, 4  ;;  %s18_s21 = sshll.u32 %s527_s20, 4  ;;  %s31_s19 = int_to_ptr.vmem [resolvable:$true] %s30_s19  ;;  %s19_s21 = int_to_ptr.vmem [resolvable:$true] %s18_s21 }
   0x4   :  { %s448_s22 = scalar_lea.vmem %s31_s19, 1024  ;;  %p453_p1 = scmp.lt.s32.totalorder %s31_s19, %s31_s19 }
   0x5   :  { %p449_p0 = scmp.ne.s32.totalorder %s31_s19, %s448_s22  ;;  %p454_p2 = scmp.lt.s32.totalorder %s448_s22, %s448_s22 }
   0x7   :  { %p455_p3 = por %p454_p2, %p453_p1 }
   0x9   :  { %p456_p4 = pnand %p455_p3, %p449_p0 }
   0xb   :  { %459 = shalt.err (!%p456_p4)
}
   0xc   :  { %s528_s23 = smov 64   ;;  %s529_s24 = smov 4  }
   0xd   :  { %36 = dma.hbm_to_vmem [thread:$0]  %s585_s1, 1024, %s31_s19, [#allocation7], %s528_s23, %s528_s23, %s529_s24  }
   0xe   :  { %s468_s27 = scalar_lea.vmem %s19_s21, 128  ;;  %p473_p6 = scmp.lt.s32.totalorder %s19_s21, %s19_s21 }
   0xf   :  { %p469_p5 = scmp.ne.s32.totalorder %s19_s21, %s468_s27  ;;  %p474_p7 = scmp.lt.s32.totalorder %s468_s27, %s468_s27 }
  0x11   :  { %p475_p8 = por %p474_p7, %p473_p6 }
  0x13   :  { %p476_p9 = pnand %p475_p8, %p469_p5 }
  0x15   :  { %479 = shalt.err (!%p476_p9)
}
  0x16   :  { %24 = dma.hbm_to_vmem [thread:$0]  %s584_s0, 128, %s19_s21, [#allocation4], %s528_s23, %s528_s23, %s529_s24  }
  0x17   :  { %s530_s30 = smov [#allocation8]  }
  0x18   :  { %s44_s6 = sshll.u32 %s530_s30, 4  ;;  %s45_s6 = int_to_ptr.vmem [resolvable:$true] %s44_s6 }
  0x19   :  { %s488_s7 = scalar_lea.vmem %s45_s6, 1024  ;;  %p493_p11 = scmp.lt.s32.totalorder %s45_s6, %s45_s6 }
  0x1a   :  { %p489_p10 = scmp.ne.s32.totalorder %s45_s6, %s488_s7  ;;  %p494_p12 = scmp.lt.s32.totalorder %s488_s7, %s488_s7 }
  0x1c   :  { %p495_p13 = por %p494_p12, %p493_p11 }
  0x1e   :  { %p496_p0 = pnand %p495_p13, %p489_p10 }
  0x20   :  { %499 = shalt.err (!%p496_p0)
}
  0x21   :  { %50 = dma.hbm_to_vmem [thread:$0]  %s587_s3, 1024, %s45_s6, [#allocation7], %s528_s23, %s528_s23, %s529_s24  }
  0x22   :  { %520 = dma.done.wait [#allocation4], 128  }
  0x23   :  { %521 = vsyncadd [#allocation4], 4294967168 }
  0x24   :  { %522 = dma.done.wait [#allocation7], 2048  }
  0x25   :  { %523 = vsyncadd [#allocation7], 4294965248  ;;  %v531_v0 = vmov 0.0   ;;  %vm532_vm0 = vmmov 0   ;;  %v423_v1 = vld [vmem:[#allocation6 + $0x38] sm:$0xff]   ;;  %v424_v2 = vld [vmem:[#allocation6 + $0x30] sm:$0xff]  }
  0x26   :  { %373 = vmatprep.subr.bf16.mxu0 %v531_v0  ;;  %389 = vmatprep.mubr.msk.bf16.mxu0 %vm532_vm0, %v531_v0  ;;  %v425_v3 = vld [vmem:[#allocation6 + $0x28] sm:$0xff]   ;;  %v432_v4 = vld [vmem:[#allocation8 + $0x38] sm:$0xff]   ;;  %v426_v5 = vld [vmem:[#allocation6 + $0x20] sm:$0xff]   ;;  %s533_s11 = smov [#allocation9]  }
  0x27   :  { %393 = vmatprep.subr.bf16.mxu1 %v531_v0  ;;  %409 = vmatprep.mubr.msk.bf16.mxu1 %vm532_vm0, %v531_v0  ;;  %v433_v6 = vld [vmem:[#allocation8 + $0x30] sm:$0xff]   ;;  %v427_v7 = vld [vmem:[#allocation6 + $0x18] sm:$0xff]   ;;  %v434_v8 = vld [vmem:[#allocation8 + $0x28] sm:$0xff]   ;;  %s323_s12 = sshll.u32 %s533_s11, 4  ;;  %s324_s12 = int_to_ptr.vmem [resolvable:$true] %s323_s12 }
  0x28   :  { %374 = vmatpush3.bf16.msra.mxu0 %v423_v1  ;;  %394 = vmatpush3.bf16.msra.mxu1 %v432_v4  ;;  %v428_v9 = vld [vmem:[#allocation6 + $0x10] sm:$0xff]   ;;  %v435_v10 = vld [vmem:[#allocation8 + $0x20] sm:$0xff]   ;;  %v429_v11 = vld [vmem:[#allocation6 + $0x8] sm:$0xff]   ;;  %p505_p2 = scmp.lt.s32.totalorder %s324_s12, %s324_s12 }
  0x29   :  { %375 = vmatprep.subr.bf16.mxu0 %v531_v0  ;;  %395 = vmatprep.subr.bf16.mxu1 %v531_v0  ;;  %v436_v12 = vld [vmem:[#allocation8 + $0x18] sm:$0xff]   ;;  %v430_v13 = vld [vmem:[#allocation6] sm:$0xff]   ;;  %v437_v15 = vld [vmem:[#allocation8 + $0x10] sm:$0xff]  }
  0x2a   :  { %v431_v14 = vld [vmem:[#allocation3] sm:$0xff]   ;;  %v438_v16 = vld [vmem:[#allocation8 + $0x8] sm:$0xff]   ;;  %v439_v17 = vld [vmem:[#allocation8] sm:$0xff]  }
  0x2b   :  { %v337_v18 = vld [vmem:[%s586_s2] ss:$0 sm:$0xff]  ;;  %s500_s2 = scalar_lea.vmem %s324_s12, 256 }
  0x2c   :  { %376 = vmatpush3.bf16.msra.mxu0 %v424_v2  ;;  %396 = vmatpush3.bf16.msra.mxu1 %v433_v6  ;;  %v336_v28 = vld [vmem:[%s588_s4] ss:$0 sm:$0xff]  ;;  %p501_p1 = scmp.ne.s32.totalorder %s324_s12, %s500_s2  ;;  %p506_p3 = scmp.lt.s32.totalorder %s500_s2, %s500_s2 }
  0x2d   :  { %377 = vmatprep.subr.bf16.mxu0 %v531_v0  ;;  %397 = vmatprep.subr.bf16.mxu1 %v531_v0 }
  0x2e   :  { %p507_p4 = por %p506_p3, %p505_p2 }
  0x30   :  { %378 = vmatpush3.bf16.msra.mxu0 %v425_v3  ;;  %398 = vmatpush3.bf16.msra.mxu1 %v434_v8  ;;  %p508_p5 = pnand %p507_p4, %p501_p1 }
  0x31   :  { %379 = vmatprep.subr.bf16.mxu0 %v531_v0  ;;  %399 = vmatprep.subr.bf16.mxu1 %v531_v0 }
  0x34   :  { %380 = vmatpush3.bf16.msra.mxu0 %v426_v5  ;;  %400 = vmatpush3.bf16.msra.mxu1 %v435_v10 }
  0x35   :  { %381 = vmatprep.subr.bf16.mxu0 %v531_v0  ;;  %401 = vmatprep.subr.bf16.mxu1 %v531_v0 }
  0x38   :  { %382 = vmatpush3.bf16.msra.mxu0 %v427_v7  ;;  %402 = vmatpush3.bf16.msra.mxu1 %v436_v12 }
  0x39   :  { %383 = vmatprep.subr.bf16.mxu0 %v531_v0  ;;  %403 = vmatprep.subr.bf16.mxu1 %v531_v0 }
  0x3c   :  { %384 = vmatpush3.bf16.msra.mxu0 %v428_v9  ;;  %404 = vmatpush3.bf16.msra.mxu1 %v437_v15 }
  0x3d   :  { %385 = vmatprep.subr.bf16.mxu0 %v531_v0  ;;  %405 = vmatprep.subr.bf16.mxu1 %v531_v0 }
  0x40   :  { %386 = vmatpush3.bf16.msra.mxu0 %v429_v11  ;;  %406 = vmatpush3.bf16.msra.mxu1 %v438_v16 }
  0x41   :  { %387 = vmatprep.subr.bf16.mxu0 %v531_v0  ;;  %407 = vmatprep.subr.bf16.mxu1 %v531_v0 }
  0x44   :  { %388 = vmatpush3.bf16.msra.mxu0 %v430_v13  ;;  %408 = vmatpush3.bf16.msra.mxu1 %v439_v17 }
  0x47   :  { %390 = vmatmul.mubr.bf16.vlgmr.msra.gmra.mxu0 %v431_v14 }
 0x107   :  { %v191_v19 = vpop.f32.mrf.mxu0 }
 0x108   :  { %v192_v21 = vadd.f32 %v337_v18, %v191_v19 }
 0x109   :  { %v391_v20 = vpop.f32.mrf.mxu0 }
 0x10a   :  { %v198_v25 = vmax.f32 %v192_v21, 0.0 }
 0x10b   :  { %v194_v22 = vpop.f32.mrf.mxu0 }
 0x10c   :  { %v195_v23 = vadd.f32 %v337_v18, %v194_v22 }
 0x10d   :  { %v392_v24 = vpop.f32.mrf.mxu0 }
 0x10e   :  { %v199_v26 = vmax.f32 %v195_v23, 0.0 }
 0x110   :  { %v202_v27 = vpack.c.bf16 %v199_v26, %v198_v25 }
 0x112   :  { %410 = vmatmul.mubr.bf16.vlgmr.msra.gmra.mxu1 %v202_v27 }
 0x1d2   :  { %v301_v29 = vpop.f32.mrf.mxu1 }
 0x1d3   :  { %v308_v30 = vadd.f32 %v336_v28, %v301_v29 }
 0x1d4   :  { %v411_v31 = vpop.f32.mrf.mxu1 }
 0x1d5   :  { %316 = vst [vmem:[#allocation9] sm:$0xff] %v308_v30 }
 0x1d6   :  { %v304_v32 = vpop.f32.mrf.mxu1 }
 0x1d7   :  { %v309_v33 = vadd.f32 %v336_v28, %v304_v32 }
 0x1d8   :  { %v412_v34 = vpop.f32.mrf.mxu1 }
 0x1d9   :  { %317 = vst [vmem:[#allocation9 + $0x8] sm:$0xff] %v309_v33 }
 0x1da   :  { %511 = shalt.err (!%p508_p5)
}
 0x1db   :  { %s534_s13 = smov 128   ;;  %s535_s4 = smov 8  }
 0x1dc   :  { %329 = dma.vmem_to_hbm [thread:$0]  %s324_s12, 256, %s589_s5, [#allocation5], %s534_s13, %s534_s13, %s535_s4  }
 0x1dd   :  { %524 = dma.done.wait [#allocation5], 256  }
 0x1de   :  { %525 = vsyncadd [#allocation5], 4294967040 }
 0x1df   :  { %333 = vsyncpa [#allocation4], 1 }
 0x1e0   :  { %334 = vsyncpa [#allocation7], 1 }
 0x1e1   :  { %335 = vsyncpa [#allocation5], 1 }

</bundles_post_ra>
